<compile_context>
chip_gen: v7x
topology: tpu7x:2x2x1
jax: 0.10.0
libtpu: 0.0.40
codegen_flags: <defaults>
</compile_context>

<pallas_src>
import jax
import jax.numpy as jnp
from jax.experimental import pallas as pl
from jax.experimental.pallas import tpu as pltpu


LANE = 128      # vreg lane width: output last dim padded to this for dense stores
SUBLANE = 8
ROW_TILE = 512  # row / K tile for large graphs (fits VMEM on v5e/v6e/v7x with margin)


def _round_up(x, m):
    return ((x + m - 1) // m) * m


def gcn3_kernel(adj_ref, feat_ref, w_ref, b_ref, out_ref, acc_ref):
    """out[i] = (sum_k adj[i,k] @ feat[k]) @ W^T + b, K accumulated over grid axis 1."""
    k = pl.program_id(1)

    @pl.when(k == 0)
    def _():
        acc_ref[...] = jnp.zeros_like(acc_ref)

    # Partial h: (TM, TK) x (TK, D_pad) -> (TM, D_pad), accumulate in f32 VMEM.
    acc_ref[...] += jnp.dot(
        adj_ref[...], feat_ref[...], preferred_element_type=jnp.float32
    )

    @pl.when(k == pl.num_programs(1) - 1)
    def _():
        # Epilogue once per row-tile: apply the Linear layer (W pre-transposed).
        out_ref[...] = (
            jnp.dot(acc_ref[...], w_ref[...], preferred_element_type=jnp.float32)
            + b_ref[...]
        )


def gcn3_forward(adj, features, weight, bias):
    """GCN3.forward: Linear(adj @ features).

    adj:      (N, N) adjacency
    features: (N, D)
    weight:   (D, D)  nn.Linear weight, (out, in) layout (as in PyTorch)
    bias:     (D,)
    """
    N, D = features.shape
    assert adj.shape == (N, N)
    assert weight.shape == (D, D) and bias.shape == (D,)

    # ---- host-side padding: lane-dense D, tileable N ----
    D_pad = _round_up(max(D, LANE), LANE)
    if N <= ROW_TILE:
        N_pad = _round_up(N, SUBLANE)
        TM = TK = N_pad                       # single tile, grid (1, 1)
    else:
        N_pad = _round_up(N, ROW_TILE)
        TM = TK = ROW_TILE

    f32 = jnp.float32
    adj_p = jnp.zeros((N_pad, N_pad), f32).at[:N, :N].set(adj.astype(f32))
    feat_p = jnp.zeros((N_pad, D_pad), f32).at[:N, :D].set(features.astype(f32))
    w_t_p = jnp.zeros((D_pad, D_pad), f32).at[:D, :D].set(weight.astype(f32).T)
    b_p = jnp.zeros((1, D_pad), f32).at[0, :D].set(bias.astype(f32))

    grid = (N_pad // TM, N_pad // TK)

    # Per-step VMEM working set: double-buffered adj/feat/W/bias/out tiles + acc.
    work_bytes = 4 * (
        2 * TM * TK          # adj tile (double buffered)
        + 2 * TK * D_pad     # features tile
        + 2 * D_pad * D_pad  # W^T (resident, budgeted conservatively)
        + 2 * D_pad          # bias
        + 2 * TM * D_pad     # out tile
        + TM * D_pad         # accumulator scratch
    )
    vmem_limit = int(min(64 << 20, max(2 * work_bytes, 32 << 20)))

    cost = pl.CostEstimate(
        flops=2 * N_pad * N_pad * D_pad + 2 * N_pad * D_pad * D_pad,
        transcendentals=0,
        bytes_accessed=4 * (
            N_pad * N_pad + N_pad * D_pad + D_pad * D_pad + D_pad + N_pad * D_pad
        ),
    )

    out_p = pl.pallas_call(
        gcn3_kernel,
        out_shape=jax.ShapeDtypeStruct((N_pad, D_pad), f32),
        grid_spec=pltpu.PrefetchScalarGridSpec(
            num_scalar_prefetch=0,
            grid=grid,
            in_specs=[
                pl.BlockSpec((TM, TK), lambda i, k: (i, k)),        # adj: streamed tiles
                pl.BlockSpec((TK, D_pad), lambda i, k: (k, 0)),     # features: K tiles
                pl.BlockSpec((D_pad, D_pad), lambda i, k: (0, 0)),  # W^T: resident
                pl.BlockSpec((1, D_pad), lambda i, k: (0, 0)),      # bias: resident
            ],
            out_specs=pl.BlockSpec((TM, D_pad), lambda i, k: (i, 0)),
            scratch_shapes=[pltpu.VMEM((TM, D_pad), f32)],
        ),
        compiler_params=pltpu.CompilerParams(
            dimension_semantics=("parallel", "arbitrary"),
            vmem_limit_bytes=vmem_limit,
        ),
        cost_estimate=cost,
    )(adj_p, feat_p, w_t_p, b_p)

    return out_p[:N, :D]


def _reference(adj, features, weight, bias):
    h = jnp.matmul(adj, features, precision=jax.lax.Precision.HIGHEST)
    return jnp.matmul(h, weight.T, precision=jax.lax.Precision.HIGHEST) + bias


if __name__ == "__main__":
    key = jax.random.PRNGKey(0)

    def make_case(key, n, d):
        k_adj, k_feat, k_w, k_b = jax.random.split(key, 4)
        adj = jax.random.uniform(k_adj, (n, n), dtype=jnp.float32)
        feat = jax.random.normal(k_feat, (n, d), dtype=jnp.float32)
        bound = 1.0 / jnp.sqrt(d)
        w = jax.random.uniform(k_w, (d, d), minval=-bound, maxval=bound, dtype=jnp.float32)
        b = jax.random.uniform(k_b, (d,), minval=-bound, maxval=bound, dtype=jnp.float32)
        return adj, feat, w, b

    # Case 1: small graph consistent with the module (input_size = 32).
    k1, k2 = jax.random.split(key)
    adj, feat, w, b = make_case(k1, 16, 32)
    # TODO(synk): GCN3 also constructs `decoder = nn.Linear(input_size, 1)` which is
    # never applied in forward(); it is intentionally omitted here.
    out = jax.block_until_ready(gcn3_forward(adj, feat, w, b))
    ref = _reference(adj, feat, w, b)
    assert out.shape == (16, 32)
    assert jnp.allclose(out, ref, rtol=1e-3, atol=1e-2), "mismatch vs reference (N=16)"

    # Case 2: exercises the real grid (row tiles + K accumulation + padding).
    adj2, feat2, w2, b2 = make_case(k2, 600, 32)
    out2 = jax.block_until_ready(gcn3_forward(adj2, feat2, w2, b2))
    ref2 = _reference(adj2, feat2, w2, b2)
    assert out2.shape == (600, 32)
    assert jnp.allclose(out2, ref2, rtol=1e-3, atol=1e-2), "mismatch vs reference (N=600)"

    print("KERNEL_OK")
</pallas_src>

<mosaic_0001>
module attributes {stable_mosaic.version = 11 : i64} {
  func.func @gcn3_kernel(%arg0: i32, %arg1: i32, %arg2: memref<16x16xf32, #tpu.memory_space<vmem>>, %arg3: memref<16x128xf32, #tpu.memory_space<vmem>>, %arg4: memref<128x128xf32, #tpu.memory_space<vmem>>, %arg5: memref<1x128xf32, #tpu.memory_space<vmem>>, %arg6: memref<16x128xf32, #tpu.memory_space<vmem>>, %arg7: memref<16x128xf32, #tpu.memory_space<vmem>>) attributes {dimension_semantics = [#tpu.dimension_semantics<parallel>, #tpu.dimension_semantics<arbitrary>], iteration_bounds = array<i64: 1, 1>, scalar_prefetch = 0 : i64, scratch_operands = 1 : i64, tpu.core_type = #tpu.core_type<tc>, window_params = [{transform_indices = @transform_0, window_bounds = array<i64: 16, 16>}, {transform_indices = @transform_1, window_bounds = array<i64: 16, 128>}, {pipeline_mode = #tpu.pipeline_mode<synchronous>, transform_indices = @transform_2, window_bounds = array<i64: 128, 128>}, {pipeline_mode = #tpu.pipeline_mode<synchronous>, transform_indices = @transform_3, window_bounds = array<i64: 1, 128>}, {transform_indices = @transform_4, window_bounds = array<i64: 16, 128>}]} {
    %c0_i32 = arith.constant 0 : i32
    %0 = arith.cmpi eq, %arg1, %c0_i32 : i32
    %1 = arith.extui %0 : i1 to i32
    %c0_i32_0 = arith.constant 0 : i32
    %2 = arith.cmpi ne, %1, %c0_i32_0 : i32
    scf.if %2 {
      %cst_10 = arith.constant 0.000000e+00 : f32
      %12 = vector.broadcast %cst_10 : f32 to vector<16x128xf32>
      %c0_11 = arith.constant 0 : index
      %c0_12 = arith.constant 0 : index
      %13 = vector.load %arg7[%c0_11, %c0_12] : memref<16x128xf32, #tpu.memory_space<vmem>>, vector<16x128xf32>
      tpu.vector_store %arg7[%c0_11, %c0_12], %12 {strides = array<i32>} : memref<16x128xf32, #tpu.memory_space<vmem>>, vector<16x128xf32>,
    } else {
    }
    %c0 = arith.constant 0 : index
    %c0_1 = arith.constant 0 : index
    %3 = vector.load %arg7[%c0, %c0_1] : memref<16x128xf32, #tpu.memory_space<vmem>>, vector<16x128xf32>
    %c0_2 = arith.constant 0 : index
    %c0_3 = arith.constant 0 : index
    %4 = vector.load %arg2[%c0_2, %c0_3] : memref<16x16xf32, #tpu.memory_space<vmem>>, vector<16x16xf32>
    %c0_4 = arith.constant 0 : index
    %c0_5 = arith.constant 0 : index
    %5 = vector.load %arg3[%c0_4, %c0_5] : memref<16x128xf32, #tpu.memory_space<vmem>>, vector<16x128xf32>
    %cst = arith.constant dense<0.000000e+00> : vector<16x128xf32>
    %6 = tpu.matmul %4, %5, %cst {dimension_numbers = #tpu.dot_dimension_numbers<[1], [0], [0], [1], [0, 0, 1, 1], [], []>} : vector<16x16xf32>, vector<16x128xf32>, vector<16x128xf32> -> vector<16x128xf32>
    %7 = arith.addf %3, %6 : vector<16x128xf32>
    %c0_6 = arith.constant 0 : index
    %c0_7 = arith.constant 0 : index
    %8 = vector.load %arg7[%c0_6, %c0_7] : memref<16x128xf32, #tpu.memory_space<vmem>>, vector<16x128xf32>
    tpu.vector_store %arg7[%c0_6, %c0_7], %7 {strides = array<i32>} : memref<16x128xf32, #tpu.memory_space<vmem>>, vector<16x128xf32>,
    %c0_i32_8 = arith.constant 0 : i32
    %9 = arith.cmpi eq, %arg1, %c0_i32_8 : i32
    %10 = arith.extui %9 : i1 to i32
    %c0_i32_9 = arith.constant 0 : i32
    %11 = arith.cmpi ne, %10, %c0_i32_9 : i32
    scf.if %11 {
      %c0_10 = arith.constant 0 : index
      %c0_11 = arith.constant 0 : index
      %12 = vector.load %arg7[%c0_10, %c0_11] : memref<16x128xf32, #tpu.memory_space<vmem>>, vector<16x128xf32>
      %c0_12 = arith.constant 0 : index
      %c0_13 = arith.constant 0 : index
      %13 = vector.load %arg4[%c0_12, %c0_13] : memref<128x128xf32, #tpu.memory_space<vmem>>, vector<128x128xf32>
      %cst_14 = arith.constant dense<0.000000e+00> : vector<16x128xf32>
      %14 = tpu.matmul %12, %13, %cst_14 {dimension_numbers = #tpu.dot_dimension_numbers<[1], [0], [0], [1], [0, 0, 1, 1], [], []>} : vector<16x128xf32>, vector<128x128xf32>, vector<16x128xf32> -> vector<16x128xf32>
      %c0_15 = arith.constant 0 : index
      %c0_16 = arith.constant 0 : index
      %15 = vector.load %arg5[%c0_15, %c0_16] : memref<1x128xf32, #tpu.memory_space<vmem>>, vector<1x128xf32>
      %16 = vector.broadcast %15 : vector<1x128xf32> to vector<16x128xf32>
      %17 = arith.addf %14, %16 : vector<16x128xf32>
      %c0_17 = arith.constant 0 : index
      %c0_18 = arith.constant 0 : index
      %18 = vector.load %arg6[%c0_17, %c0_18] : memref<16x128xf32, #tpu.memory_space<vmem>>, vector<16x128xf32>
      tpu.vector_store %arg6[%c0_17, %c0_18], %17 {strides = array<i32>} : memref<16x128xf32, #tpu.memory_space<vmem>>, vector<16x128xf32>,
    } else {
    }
    return
  }
  func.func @transform_0(%arg0: i32, %arg1: i32) -> (i32, i32) {
    %c0_i32 = arith.constant 0 : i32
    return %arg0, %arg1 : i32, i32
  }
  func.func @transform_1(%arg0: i32, %arg1: i32) -> (i32, i32) {
    %c0_i32 = arith.constant 0 : i32
    %c0_i32_0 = arith.constant 0 : i32
    return %arg1, %c0_i32 : i32, i32
  }
  func.func @transform_2(%arg0: i32, %arg1: i32) -> (i32, i32) {
    %c0_i32 = arith.constant 0 : i32
    %c0_i32_0 = arith.constant 0 : i32
    %c0_i32_1 = arith.constant 0 : i32
    return %c0_i32, %c0_i32_0 : i32, i32
  }
  func.func @transform_3(%arg0: i32, %arg1: i32) -> (i32, i32) {
    %c0_i32 = arith.constant 0 : i32
    %c0_i32_0 = arith.constant 0 : i32
    %c0_i32_1 = arith.constant 0 : i32
    return %c0_i32, %c0_i32_0 : i32, i32
  }
  func.func @transform_4(%arg0: i32, %arg1: i32) -> (i32, i32) {
    %c0_i32 = arith.constant 0 : i32
    %c0_i32_0 = arith.constant 0 : i32
    return %arg0, %c0_i32 : i32, i32
  }
}

</mosaic_0001>

<bundles_post_ra>
// kernel: tpu_custom_call.1
= control target key start
LH: loop header
LB: loop body
LE: loop exit
PB: predicated region body
PF: predicated region fallthrough
CT: control target
= control target key end

     0   :  { %9 = vsyncpa [#allocation4], 0  ;;  %s586_s0 = inlined_call_operand.hbm [shape: f32[16,16], index: 0, kind: input, shape index: {}]   ;;  %s587_s1 = inlined_call_operand.hbm [shape: f32[16,128], index: 1, kind: input, shape index: {}]   ;;  %s588_s2 = inlined_call_operand.hbm [shape: f32[128,128], index: 2, kind: input, shape index: {}]   ;;  %s589_s3 = inlined_call_operand.vmem [shape: f32[1,128], index: 3, kind: input, shape index: {}]   ;;  %s590_s4 = inlined_call_operand.hbm [shape: f32[16,128], index: 4, kind: output, shape index: {}]  }
   0x1   :  { %10 = vsyncpa [#allocation7], 0 }
   0x2   :  { %11 = vsyncpa [#allocation5], 0  ;;  %s483_s15 = smov [#allocation6]   ;;  %s484_s17 = smov [#allocation3]  }
   0x3   :  { %s29_s16 = sshll.u32 %s483_s15, 4  ;;  %s17_s18 = sshll.u32 %s484_s17, 4  ;;  %s30_s16 = int_to_ptr.vmem [resolvable:$true] %s29_s16  ;;  %s514_s18 = int_to_ptr.vmem [resolvable:$true] %s17_s18 }
   0x4   :  { %s389_s21 = scalar_lea.hbm %s587_s1, 256 }
   0x5   :  { %p390_p0 = scmp.ne.s32.totalorder %s587_s1, %s389_s21  ;;  %p393_p1 = scmp.lt.u32.totalorder %s389_s21, %s587_s1 }
   0x7   :  { %p395_p2 = pnand %p393_p1, %p390_p0 }
   0x9   :  { %398 = shalt.err (!%p395_p2)
}
   0xa   :  { %s399_s26 = scalar_lea.vmem %s30_s16, 256  ;;  %p404_p4 = scmp.lt.s32.totalorder %s30_s16, %s30_s16 }
   0xb   :  { %p400_p3 = scmp.ne.s32.totalorder %s30_s16, %s399_s26  ;;  %p405_p5 = scmp.lt.s32.totalorder %s399_s26, %s399_s26 }
   0xd   :  { %p406_p6 = por %p405_p5, %p404_p4 }
   0xf   :  { %p407_p7 = pnand %p406_p6, %p400_p3 }
  0x11   :  { %410 = shalt.err (!%p407_p7)
}
  0x12   :  { %s485_s27 = smov 128   ;;  %s486_s28 = smov 8  }
  0x13   :  { %35 = dma.hbm_to_vmem [thread:$0]  %s587_s1, 256, %s30_s16, [#allocation7], %s485_s27, %s485_s27, %s486_s28  }
  0x14   :  { %s411_s7 = scalar_lea.hbm %s586_s0, 256 }
  0x15   :  { %p412_p8 = scmp.ne.s32.totalorder %s586_s0, %s411_s7  ;;  %p415_p9 = scmp.lt.u32.totalorder %s411_s7, %s586_s0 }
  0x17   :  { %p417_p10 = pnand %p415_p9, %p412_p8 }
  0x19   :  { %420 = shalt.err (!%p417_p10)
}
  0x1a   :  { %s421_s12 = scalar_lea.vmem %s514_s18, 256  ;;  %p426_p12 = scmp.lt.s32.totalorder %s514_s18, %s514_s18 }
  0x1b   :  { %p422_p11 = scmp.ne.s32.totalorder %s514_s18, %s421_s12  ;;  %p427_p13 = scmp.lt.s32.totalorder %s421_s12, %s421_s12 }
  0x1d   :  { %p428_p0 = por %p427_p13, %p426_p12 }
  0x1f   :  { %p429_p1 = pnand %p428_p0, %p422_p11 }
  0x21   :  { %432 = shalt.err (!%p429_p1)
}
  0x22   :  { %23 = dma.hbm_to_vmem [thread:$0]  %s586_s0, 256, %s514_s18, [#allocation4], %s485_s27, %s485_s27, %s486_s28  }
  0x23   :  { %s487_s14 = smov [#allocation8]   ;;  %s433_s19 = scalar_lea.hbm %s588_s2, 2048 }
  0x24   :  { %s41_s15 = sshll.u32 %s487_s14, 4  ;;  %p434_p2 = scmp.ne.s32.totalorder %s588_s2, %s433_s19  ;;  %s42_s15 = int_to_ptr.vmem [resolvable:$true] %s41_s15 }
  0x25   :  { %p437_p3 = scmp.lt.u32.totalorder %s433_s19, %s588_s2 }
  0x27   :  { %p439_p4 = pnand %p437_p3, %p434_p2 }
  0x29   :  { %442 = shalt.err (!%p439_p4)
}
  0x2a   :  { %s443_s24 = scalar_lea.vmem %s42_s15, 2048  ;;  %p448_p6 = scmp.lt.s32.totalorder %s42_s15, %s42_s15 }
  0x2b   :  { %p444_p5 = scmp.ne.s32.totalorder %s42_s15, %s443_s24  ;;  %p449_p7 = scmp.lt.s32.totalorder %s443_s24, %s443_s24 }
  0x2d   :  { %p450_p8 = por %p449_p7, %p448_p6 }
  0x2f   :  { %p451_p9 = pnand %p450_p8, %p444_p5 }
  0x31   :  { %454 = shalt.err (!%p451_p9)
}
  0x32   :  { %47 = dma.hbm_to_vmem [thread:$0]  %s588_s2, 2048, %s42_s15, [#allocation7], %s485_s27, %s485_s27, %s486_s28  }
  0x33   :  { %477 = dma.done.wait [#allocation4], 256  }
  0x34   :  { %478 = vsyncadd [#allocation4], 4294967040 }
  0x35   :  { %479 = dma.done.wait [#allocation7], 2304  }
  0x36   :  { %480 = vsyncadd [#allocation7], 4294964992  ;;  %vm71_vm0 = vcmask 130048   ;;  %v69_v0 = vld [vmem:[#allocation6] sm:$0xff]  ;;  %v70_v1 = vld [vmem:[#allocation6 + $0x8] sm:$0xff]  ;;  %s488_s26 = smov [#allocation9]  }
  0x37   :  { %v67_v2 = vld [vmem:[#allocation3] sm:$0xff]  ;;  %v347_v3 = vpack.c.bf16 %v70_v1, %v69_v0  ;;  %v163_v5 = vld [vmem:[#allocation8 + $0x8] sm:$0xff]  ;;  %v164_v7 = vld [vmem:[#allocation8 + $0x10] sm:$0xff]  ;;  %s267_s29 = sshll.u32 %s488_s26, 4  ;;  %s268_s29 = int_to_ptr.vmem [resolvable:$true] %s267_s29 }
  0x38   :  { %309 = vmatprep.mubr.msk.f32.mxu0 %vm71_vm0, %v67_v2  ;;  %v162_v4 = vld [vmem:[#allocation8] sm:$0xff]  ;;  %v165_v8 = vld [vmem:[#allocation8 + $0x18] sm:$0xff]  ;;  %v167_v11 = vld [vmem:[#allocation8 + $0x28] sm:$0xff]  ;;  %s455_s30 = scalar_lea.vmem %s268_s29, 256  ;;  %p460_p11 = scmp.lt.s32.totalorder %s268_s29, %s268_s29 }
  0x39   :  { %v351_v6 = vpack.c.bf16 %v163_v5, %v162_v4  ;;  %348 = vmatprep.subr.bf16.mxu0 %v347_v3  ;;  %v355_v9 = vpack.c.bf16 %v165_v8, %v164_v7  ;;  %v166_v10 = vld [vmem:[#allocation8 + $0x20] sm:$0xff]  ;;  %v68_v12 = vld [vmem:[#allocation3 + $0x8] sm:$0xff]  ;;  %v168_v14 = vld [vmem:[#allocation8 + $0x30] sm:$0xff]  ;;  %p456_p10 = scmp.ne.s32.totalorder %s268_s29, %s455_s30  ;;  %p461_p12 = scmp.lt.s32.totalorder %s455_s30, %s455_s30 }
  0x3a   :  { %350 = vmatpush3.bf16.msra.mxu0 %v347_v3  ;;  %v359_v13 = vpack.c.bf16 %v167_v11, %v166_v10  ;;  %v169_v15 = vld [vmem:[#allocation8 + $0x38] sm:$0xff]  ;;  %v170_v17 = vld [vmem:[#allocation8 + $0x40] sm:$0xff]  ;;  %v171_v18 = vld [vmem:[#allocation8 + $0x48] sm:$0xff] }
  0x3b   :  { %352 = vmatprep.subr.bf16.mxu1 %v351_v6  ;;  %v363_v16 = vpack.c.bf16 %v169_v15, %v168_v14  ;;  %v367_v19 = vpack.c.bf16 %v171_v18, %v170_v17  ;;  %v172_v20 = vld [vmem:[#allocation8 + $0x50] sm:$0xff]  ;;  %v173_v21 = vld [vmem:[#allocation8 + $0x58] sm:$0xff]  ;;  %v174_v23 = vld [vmem:[#allocation8 + $0x60] sm:$0xff]  ;;  %p462_p13 = por %p461_p12, %p460_p11 }
  0x3c   :  { %354 = vmatpush3.bf16.msra.mxu1 %v351_v6  ;;  %v371_v22 = vpack.c.bf16 %v173_v21, %v172_v20  ;;  %v175_v24 = vld [vmem:[#allocation8 + $0x68] sm:$0xff]  ;;  %v176_v26 = vld [vmem:[#allocation8 + $0x70] sm:$0xff]  ;;  %v177_v27 = vld [vmem:[#allocation8 + $0x78] sm:$0xff] }
  0x3d   :  { %356 = vmatprep.subr.bf16.mxu1 %v355_v9  ;;  %310 = vmatmul.mubr.msk.f32.vlgmr.msra.gmra.mrb[0].mxu0 %vm71_vm0, %v68_v12  ;;  %v375_v25 = vpack.c.bf16 %v175_v24, %v174_v23  ;;  %v379_v28 = vpack.c.bf16 %v177_v27, %v176_v26  ;;  %v282_v31 = vld [vmem:[%s589_s3] ss:$0 sm:$0xff]  ;;  %p463_p0 = pnand %p462_p13, %p456_p10 }
  0x40   :  { %358 = vmatpush3.bf16.msra.mxu1 %v355_v9 }
  0x41   :  { %360 = vmatprep.subr.bf16.mxu1 %v359_v13 }
  0x44   :  { %362 = vmatpush3.bf16.msra.mxu1 %v359_v13 }
  0x45   :  { %364 = vmatprep.subr.bf16.mxu1 %v363_v16 }
  0x48   :  { %366 = vmatpush3.bf16.msra.mxu1 %v363_v16 }
  0x49   :  { %368 = vmatprep.subr.bf16.mxu1 %v367_v19 }
  0x4c   :  { %370 = vmatpush3.bf16.msra.mxu1 %v367_v19 }
  0x4d   :  { %372 = vmatprep.subr.bf16.mxu1 %v371_v22 }
  0x50   :  { %374 = vmatpush3.bf16.msra.mxu1 %v371_v22 }
  0x51   :  { %376 = vmatprep.subr.bf16.mxu1 %v375_v25 }
  0x54   :  { %378 = vmatpush3.bf16.msra.mxu1 %v375_v25 }
  0x55   :  { %380 = vmatprep.subr.bf16.mxu1 %v379_v28 }
  0x58   :  { %382 = vmatpush3.bf16.msra.mxu1 %v379_v28 }
 0x110   :  { %v311_v29 = vpop.f32.mrb[0].mxu0 }
 0x111   :  { %v144_v30 = vpop.f32.mrb[1].mxu0 }
 0x112   :  { %344 = vmatprep.mubr.f32.mxu1 %v144_v30 }
 0x113   :  { %345 = vmatmul.mubr.f32.vlgmr.msra.gmra.mrb[0].mxu1 %v311_v29 }
 0x1e6   :  { %v346_v32 = vpop.f32.mrb[0].mxu1 }
 0x1e7   :  { %v257_v33 = vadd.f32 %v346_v32, %v282_v31  ;;  %v251_v34 = vpop.f32.mrb[1].mxu1 }
 0x1e8   :  { %v252_v35 = vadd.f32 %v282_v31, %v251_v34 }
 0x1e9   :  { %261 = vst [vmem:[#allocation9 + $0x8] sm:$0xff] %v257_v33 }
 0x1ea   :  { %260 = vst [vmem:[#allocation9] sm:$0xff] %v252_v35 }
 0x1eb   :  { %466 = shalt.err (!%p463_p0)
}
 0x1ec   :  { %s467_s3 = scalar_lea.hbm %s590_s4, 256 }
 0x1ed   :  { %p468_p1 = scmp.ne.s32.totalorder %s590_s4, %s467_s3  ;;  %p471_p2 = scmp.lt.u32.totalorder %s467_s3, %s590_s4 }
 0x1ef   :  { %p473_p3 = pnand %p471_p2, %p468_p1 }
 0x1f1   :  { %476 = shalt.err (!%p473_p3)
}
 0x1f2   :  { %273 = dma.vmem_to_hbm [thread:$0]  %s268_s29, 256, %s590_s4, [#allocation5], %s485_s27, %s485_s27, %s486_s28  }
 0x1f3   :  { %481 = dma.done.wait [#allocation5], 256  }
 0x1f4   :  { %482 = vsyncadd [#allocation5], 4294967040 }
 0x1f5   :  { %277 = vsyncpa [#allocation4], 1 }
 0x1f6   :  { %278 = vsyncpa [#allocation7], 1 }
 0x1f7   :  { %279 = vsyncpa [#allocation5], 1 }

</bundles_post_ra>
